<compile_context>
chip_gen: v6e
topology: v6e:2x2x1
jax: 0.10.0
libtpu: 0.0.40
codegen_flags: <defaults>
</compile_context>

<pallas_src>
import functools

import jax
import jax.numpy as jnp
from jax.experimental import pallas as pl
from jax.experimental.pallas import tpu as pltpu


_MIN_PALLAS_BYTES = 2 * 1024 * 1024   # below ~2 MiB of candidate bytes the fused XLA reduce wins


def _round_up(x, m):
    return ((x + m - 1) // m) * m


@functools.lru_cache(maxsize=1)
def _vmem_params():
    """Returns (vmem_limit_bytes, target bytes per candidate block, dual_core)."""
    limit, target, dual_core = 64 * 1024 * 1024, 4 * 1024 * 1024, False
    try:
        cap = int(pltpu.get_tpu_info().vmem_capacity_bytes)
        if cap <= 64 * 1024 * 1024:
            # v7x-class: 64 MiB VMEM/TC, 2 TensorCores, ~3.2 TB/s HBM.  Bigger per-step
            # bytes (step overhead is relatively more expensive), but leave headroom
            # below physical capacity for compiler-internal scratch.
            limit, target, dual_core = min(48 * 1024 * 1024, (cap * 3) // 4), 8 * 1024 * 1024, True
        else:
            # v5e/v6e-class: 128 MiB VMEM, single TensorCore.
            limit, target, dual_core = min(96 * 1024 * 1024, (cap * 3) // 4), 4 * 1024 * 1024, False
    except Exception:
        pass
    return limit, target, dual_core


def _block_vmem_bytes(tb, tn, D, in_itemsize, out_itemsize, broadcast_ori):
    """Double-buffered VMEM footprint of one grid step with (sublane, lane) padding."""
    sub_in = max(8, 32 // in_itemsize)
    sub_out = max(8, 32 // out_itemsize)
    d_pad = _round_up(D, 128)
    cand = tb * _round_up(tn, sub_in) * d_pad * in_itemsize
    ori = tb * (sub_in if broadcast_ori else _round_up(tn, sub_in)) * d_pad * in_itemsize
    out = _round_up(tb, sub_out) * _round_up(tn, 128) * out_itemsize
    return 2 * (cand + ori + out)


def _pick_tiles(B, N, D, in_itemsize, broadcast_ori, target_bytes, dual_core):
    """Pick (tb, tn) so a candidate block is ~target_bytes of padded VMEM while keeping
    every block layout-legal: tb == B or tb % 8 == 0, tn == N or tn % 128 == 0."""
    sub = max(8, 32 // in_itemsize)
    d_pad = _round_up(D, 128)
    row_bytes = d_pad * in_itemsize * 2                  # double-buffered candidate row
    if in_itemsize < 4:
        row_bytes += d_pad * 4                           # f32 upcast working set (vreg/spill)
    if not broadcast_ori:
        row_bytes *= 2                                   # ori stream is row-tiled alongside cand
    rows_budget = max(sub, int(target_bytes // max(row_bytes, 1)))

    n_rows = _round_up(N, sub)
    if n_rows > rows_budget:
        # N alone exceeds the budget: keep tb minimal-but-legal and split N.
        tb = B if B <= 8 else 8
        tn = max(128, ((rows_budget // tb) // 128) * 128)
    else:
        tn = N
        tb_budget = max(1, rows_budget // n_rows)
        if tb_budget >= B:
            tb = B
        elif B > 8:
            tb = max(8, (tb_budget // 8) * 8)
        else:
            tb = B                                       # cannot legally tile below B when B <= 8
            if N > 128:                                  # split N instead to bound the block
                tn = max(128, ((rows_budget // B) // 128) * 128)
    if tn >= N:
        tn = N

    # Only v7x-class chips have 2 TensorCores: if the whole problem would be a single
    # grid step, split once so both cores get work.  On v5e/v6e this would only add
    # per-step overhead, so it is gated on dual_core.
    if dual_core and tb >= B and tn >= N:
        if B >= 16:
            tb = _round_up(pl.cdiv(B, 2), 8)
        elif N >= 256:
            tn = _round_up(pl.cdiv(N, 2), 128)
    return tb, tn


def _make_matcher_kernel(acc_dtype):
    def kernel(ori_ref, cand_ref, out_ref):
        # ori_ref:  (tb, 1, D) when ori is broadcast over N, else (tb, tn, D)
        # cand_ref: (tb, tn, D)
        # out_ref:  (tb, tn)   -- lane-dense: tn maps to the 128-lane axis
        a = ori_ref[...].astype(acc_dtype)
        c = cand_ref[...].astype(acc_dtype)
        out_ref[...] = jnp.sum(a * c, axis=-1).astype(out_ref.dtype)
    return kernel


def _rowwise_dot_xla3(ori3, cand3, out_dtype, acc_dtype):
    """Fallback path: plain fused XLA reduce with the same accumulation semantics."""
    res = jnp.sum(ori3.astype(acc_dtype) * cand3.astype(acc_dtype), axis=-1)
    return res.reshape(-1).astype(out_dtype)


def _rowwise_dot_pallas(ori3, cand3, broadcast_ori, tb=None, tn=None):
    """ori3: (B, 1, D) [broadcast over N] or (B, N, D); cand3: (B, N, D) -> (B*N,)."""
    B, N, D = cand3.shape
    out_dtype = jnp.result_type(ori3.dtype, cand3.dtype)
    acc_dtype = jnp.float32 if jnp.issubdtype(out_dtype, jnp.inexact) else jnp.int32
    in_itemsize = max(jnp.dtype(ori3.dtype).itemsize, jnp.dtype(cand3.dtype).itemsize)
    out_itemsize = jnp.dtype(out_dtype).itemsize

    vmem_limit, target_bytes, dual_core = _vmem_params()
    auto_tb, auto_tn = _pick_tiles(B, N, D, in_itemsize, broadcast_ori, target_bytes, dual_core)
    tb = auto_tb if tb is None else tb
    tn = auto_tn if tn is None else tn

    # Degenerate shapes (huge D with tiny, un-tileable B/N) cannot be blocked small
    # enough for VMEM; hand those to the fused XLA reduce instead of failing.
    if _block_vmem_bytes(tb, tn, D, in_itemsize, out_itemsize, broadcast_ori) > vmem_limit:
        return _rowwise_dot_xla3(ori3, cand3, out_dtype, acc_dtype)

    if broadcast_ori:
        # Same (b, 0, 0) block for every n-tile: the broadcast over N lives in the
        # index_map, not as a materialized B*N*D array in HBM.
        ori_spec = pl.BlockSpec((tb, 1, D), lambda b, n: (b, 0, 0))
    else:
        ori_spec = pl.BlockSpec((tb, tn, D), lambda b, n: (b, n, 0))

    out = pl.pallas_call(
        _make_matcher_kernel(acc_dtype),
        out_shape=jax.ShapeDtypeStruct((B, N), out_dtype),
        grid_spec=pltpu.PrefetchScalarGridSpec(
            num_scalar_prefetch=0,
            grid=(pl.cdiv(B, tb), pl.cdiv(N, tn)),
            in_specs=[
                ori_spec,
                pl.BlockSpec((tb, tn, D), lambda b, n: (b, n, 0)),
            ],
            out_specs=pl.BlockSpec((tb, tn), lambda b, n: (b, n)),
        ),
        compiler_params=pltpu.CompilerParams(
            dimension_semantics=("parallel", "parallel"),
            vmem_limit_bytes=vmem_limit,
        ),
    )(ori3, cand3)
    return out.reshape(-1)


def dot_product_matcher(ori_plan_encoding, candidate_plan_encodings, *,
                        use_pallas=None, tb=None, tn=None):
    """JAX/Pallas equivalent of DotProductMatcher.forward."""
    ori = jnp.asarray(ori_plan_encoding)
    cand = jnp.asarray(candidate_plan_encodings)
    D = ori.shape[-1]

    if cand.ndim == 2:
        # (B, D) x (B, D): row-wise dot, no broadcast; view rows along the tiled axis.
        Brows = cand.shape[0]
        ori3 = ori.reshape(1, Brows, D)
        cand3 = cand.reshape(1, Brows, D)
        broadcast_ori = False
    else:
        # (B, D) x (B, N, D): ori broadcast over N handled by the BlockSpec index_map.
        ori3 = ori[:, None, :]
        cand3 = cand
        broadcast_ori = True

    if use_pallas is None:
        cand_bytes = cand3.size * jnp.dtype(cand3.dtype).itemsize
        # TODO(synk): for D < 128 a lane-folding variant (pack 128//D rows per vreg row)
        # would recover lane density; for now padded-D shapes go to the fused XLA reduce.
        use_pallas = cand_bytes >= _MIN_PALLAS_BYTES and D % 128 == 0

    if not use_pallas:
        out_dtype = jnp.result_type(ori3.dtype, cand3.dtype)
        acc_dtype = jnp.float32 if jnp.issubdtype(out_dtype, jnp.inexact) else jnp.int32
        return _rowwise_dot_xla3(ori3, cand3, out_dtype, acc_dtype)

    return _rowwise_dot_pallas(ori3, cand3, broadcast_ori, tb=tb, tn=tn)


if __name__ == "__main__":
    key = jax.random.PRNGKey(0)
    k1, k2, k3, k4, k5, k6, k7 = jax.random.split(key, 7)

    # Small shapes consistent with the module.
    B, N, D = 2, 8, 32
    ori = jax.random.normal(k1, (B, D), dtype=jnp.float32)
    cand_3d = jax.random.normal(k2, (B, N, D), dtype=jnp.float32)
    cand_2d = jax.random.normal(k3, (B, D), dtype=jnp.float32)

    # 3-D candidate case (Pallas path forced so the kernel is exercised at tiny size).
    sims_3d = jax.block_until_ready(dot_product_matcher(ori, cand_3d, use_pallas=True))
    ref_3d = jnp.einsum("bd,bnd->bn", ori, cand_3d).reshape(-1)
    assert sims_3d.shape == (B * N,)
    assert jnp.allclose(sims_3d, ref_3d, atol=1e-5, rtol=1e-5)

    # 2-D candidate case.
    sims_2d = jax.block_until_ready(dot_product_matcher(ori, cand_2d, use_pallas=True))
    ref_2d = jnp.sum(ori * cand_2d, axis=-1)
    assert sims_2d.shape == (B,)
    assert jnp.allclose(sims_2d, ref_2d, atol=1e-5, rtol=1e-5)

    # Multi-step N tiling with lane-dense output + masked partial tail (300 = 2*128 + 44).
    B2, N2, D2 = 3, 300, 128
    ori2 = jax.random.normal(k4, (B2, D2), dtype=jnp.float32)
    cand2 = jax.random.normal(k5, (B2, N2, D2), dtype=jnp.float32)
    sims_l = jax.block_until_ready(dot_product_matcher(ori2, cand2, use_pallas=True, tn=128))
    ref_l = jnp.einsum("bd,bnd->bn", ori2, cand2).reshape(-1)
    assert sims_l.shape == (B2 * N2,)
    assert jnp.allclose(sims_l, ref_l, atol=1e-4, rtol=1e-4)

    # B-axis tiling (tb=8) with a masked partial tail along B (20 = 2*8 + 4).
    B3, N3, D3 = 20, 16, 128
    ori_b = jax.random.normal(k6, (B3, D3), dtype=jnp.float32)
    cand_b = jax.random.normal(k7, (B3, N3, D3), dtype=jnp.float32)
    sims_b = jax.block_until_ready(dot_product_matcher(ori_b, cand_b, use_pallas=True, tb=8))
    ref_b = jnp.einsum("bd,bnd->bn", ori_b, cand_b).reshape(-1)
    assert sims_b.shape == (B3 * N3,)
    assert jnp.allclose(sims_b, ref_b, atol=1e-4, rtol=1e-4)

    # Auto-dispatch (tiny problem -> XLA fast path) still matches.
    sims_auto = jax.block_until_ready(dot_product_matcher(ori, cand_3d))
    assert jnp.allclose(sims_auto, ref_3d, atol=1e-5, rtol=1e-5)

    print("KERNEL_OK")
</pallas_src>

<mosaic_0001>
module attributes {stable_mosaic.version = 11 : i64} {
  func.func @kernel(%arg0: i32, %arg1: i32, %arg2: memref<2x1x32xf32, #tpu.memory_space<vmem>>, %arg3: memref<2x8x32xf32, #tpu.memory_space<vmem>>, %arg4: memref<2x8xf32, #tpu.memory_space<vmem>>) attributes {dimension_semantics = [#tpu.dimension_semantics<parallel>, #tpu.dimension_semantics<parallel>], iteration_bounds = array<i64: 1, 1>, scalar_prefetch = 0 : i64, scratch_operands = 0 : i64, tpu.core_type = #tpu.core_type<tc>, window_params = [{transform_indices = @transform_0, window_bounds = array<i64: 2, 1, 32>}, {transform_indices = @transform_1, window_bounds = array<i64: 2, 8, 32>}, {transform_indices = @transform_2, window_bounds = array<i64: 2, 8>}]} {
    %c0 = arith.constant 0 : index
    %c0_0 = arith.constant 0 : index
    %c0_1 = arith.constant 0 : index
    %0 = vector.load %arg2[%c0, %c0_0, %c0_1] : memref<2x1x32xf32, #tpu.memory_space<vmem>>, vector<2x1x32xf32>
    %c0_2 = arith.constant 0 : index
    %c0_3 = arith.constant 0 : index
    %c0_4 = arith.constant 0 : index
    %1 = vector.load %arg3[%c0_2, %c0_3, %c0_4] : memref<2x8x32xf32, #tpu.memory_space<vmem>>, vector<2x8x32xf32>
    %2 = vector.broadcast %0 : vector<2x1x32xf32> to vector<2x8x32xf32>
    %3 = arith.mulf %2, %1 : vector<2x8x32xf32>
    %cst = arith.constant dense<0.000000e+00> : vector<2x8xf32>
    %4 = vector.multi_reduction <add>, %3, %cst [2] : vector<2x8x32xf32> to vector<2x8xf32>
    %c0_5 = arith.constant 0 : index
    %c0_6 = arith.constant 0 : index
    %5 = vector.load %arg4[%c0_5, %c0_6] : memref<2x8xf32, #tpu.memory_space<vmem>>, vector<2x8xf32>
    tpu.vector_store %arg4[%c0_5, %c0_6], %4 {strides = array<i32>} : memref<2x8xf32, #tpu.memory_space<vmem>>, vector<2x8xf32>,
    return
  }
  func.func @transform_0(%arg0: i32, %arg1: i32) -> (i32, i32, i32) {
    %c0_i32 = arith.constant 0 : i32
    %c0_i32_0 = arith.constant 0 : i32
    %c0_i32_1 = arith.constant 0 : i32
    return %arg0, %c0_i32, %c0_i32_0 : i32, i32, i32
  }
  func.func @transform_1(%arg0: i32, %arg1: i32) -> (i32, i32, i32) {
    %c0_i32 = arith.constant 0 : i32
    %c0_i32_0 = arith.constant 0 : i32
    return %arg0, %arg1, %c0_i32 : i32, i32, i32
  }
  func.func @transform_2(%arg0: i32, %arg1: i32) -> (i32, i32) {
    %c0_i32 = arith.constant 0 : i32
    return %arg0, %arg1 : i32, i32
  }
}

</mosaic_0001>

<bundles_post_ra>
// kernel: tpu_custom_call.1
= control target key start
LH: loop header
LB: loop body
LE: loop exit
PB: predicated region body
PF: predicated region fallthrough
CT: control target
= control target key end

     0   :  { %7 = vsyncpa [#allocation3], 0  ;;  %s204_s0 = inlined_call_operand.hbm [shape: f32[2,1,32], index: 0, kind: input, shape index: {}]   ;;  %s205_s1 = inlined_call_operand.hbm [shape: f32[2,8,32], index: 1, kind: input, shape index: {}]   ;;  %s206_s2 = inlined_call_operand.hbm [shape: f32[2,8], index: 2, kind: output, shape index: {}]  }
   0x1   :  { %8 = vsyncpa [#allocation6], 0 }
   0x2   :  { %9 = vsyncpa [#allocation4], 0  ;;  %s173_s9 = smov [#allocation2]  }
   0x3   :  { %s15_s10 = sshll.u32 %s173_s9, 4  ;;  %s16_s10 = int_to_ptr.vmem [resolvable:$true] %s15_s10 }
   0x4   :  { %s115_s11 = scalar_lea.vmem %s16_s10, 32  ;;  %p120_p1 = scmp.lt.s32.totalorder %s16_s10, %s16_s10 }
   0x5   :  { %p116_p0 = scmp.ne.s32.totalorder %s16_s10, %s115_s11  ;;  %p121_p2 = scmp.lt.s32.totalorder %s115_s11, %s115_s11 }
   0x7   :  { %p122_p3 = por %p121_p2, %p120_p1 }
   0x9   :  { %p123_p4 = pnand %p122_p3, %p116_p0 }
   0xb   :  { %126 = shalt.err (!%p123_p4)
}
   0xc   :  { %s174_s12 = smov 16   ;;  %s175_s13 = smov 1  }
   0xd   :  { %21 = dma.hbm_to_vmem [thread:$0]  %s204_s0, 32, %s16_s10, [#allocation3], %s174_s12, %s174_s12, %s175_s13  }
   0xe   :  { %s176_s16 = smov [#allocation5]  }
   0xf   :  { %s27_s17 = sshll.u32 %s176_s16, 4  ;;  %s28_s17 = int_to_ptr.vmem [resolvable:$true] %s27_s17 }
  0x10   :  { %s135_s18 = scalar_lea.vmem %s28_s17, 256  ;;  %p140_p6 = scmp.lt.s32.totalorder %s28_s17, %s28_s17 }
  0x11   :  { %p136_p5 = scmp.ne.s32.totalorder %s28_s17, %s135_s18  ;;  %p141_p7 = scmp.lt.s32.totalorder %s135_s18, %s135_s18 }
  0x13   :  { %p142_p8 = por %p141_p7, %p140_p6 }
  0x15   :  { %p143_p9 = pnand %p142_p8, %p136_p5 }
  0x17   :  { %146 = shalt.err (!%p143_p9)
}
  0x18   :  { %s177_s19 = smov 128   ;;  %s178_s20 = smov 8  }
  0x19   :  { %33 = dma.hbm_to_vmem [thread:$0]  %s205_s1, 256, %s28_s17, [#allocation6], %s177_s19, %s177_s19, %s178_s20  }
  0x1a   :  { %167 = dma.done.wait [#allocation3], 32  }
  0x1b   :  { %168 = vsyncadd [#allocation3], 4294967264 }
  0x1c   :  { %169 = dma.done.wait [#allocation6], 256  }
  0x1d   :  { %170 = vsyncadd [#allocation6], 4294967040  ;;  %v98_v0 = vld [vmem:[#allocation2] ss:$0 sm:$0xff]  ;;  %v42_v1 = vld [vmem:[#allocation5] sm:$0xff]  ;;  %vm58_vm0 = vcmask 261120   ;;  %v67_v8 = vlaneseq }
  0x1e   :  { %v99_v2 = vld [vmem:[#allocation2 + $0x1] ss:$0 sm:$0xff]  ;;  %v56_v3 = vmul.f32 %v98_v0, %v42_v1  ;;  %v43_v4 = vld [vmem:[#allocation5 + $0x8] sm:$0xff]  ;;  %s179_s0 = smov [#allocation7]   ;;  %vm77_vm1 = vcmask 1041409   ;;  %vm80_vm2 = vcmask 58368  }
  0x1f   :  { %v57_v5 = vmul.f32 %v99_v2, %v43_v4  ;;  %v68_v9 = vand.u32 127, %v67_v8  ;;  %v70_v10 = vshrl.u32 %v67_v8, 7  ;;  %s88_s1 = sshll.u32 %s179_s0, 4  ;;  %s89_s1 = int_to_ptr.vmem [resolvable:$true] %s88_s1 }
  0x20   :  { %v59_v6 = vsel %vm58_vm0, %v56_v3, 0.0  ;;  %s147_s23 = scalar_lea.vmem %s89_s1, 32  ;;  %p152_p11 = scmp.lt.s32.totalorder %s89_s1, %s89_s1 }
  0x21   :  { %60 = vadd.xlane.f32.xlu0 %v59_v6  ;;  %v62_v7 = vsel %vm58_vm0, %v57_v5, 0.0  ;;  %v71_v12 = vsub.s32 %v68_v9, %v70_v10  ;;  %p148_p10 = scmp.ne.s32.totalorder %s89_s1, %s147_s23  ;;  %p153_p12 = scmp.lt.s32.totalorder %s147_s23, %s147_s23 }
  0x23   :  { %p154_p13 = por %p153_p12, %p152_p11 }
  0x25   :  { %63 = vadd.xlane.f32.xlu0 %v62_v7  ;;  %p155_p0 = pnand %p154_p13, %p148_p10 }
  0xaa   :  { %v61_v11 = vpop.xlane.xlu0 %60 }
  0xab   :  { %v72_v14 = vrot.slane %v61_v11, %v71_v12 }
  0xae   :  { %v64_v13 = vpop.xlane.xlu0 %63 }
  0xaf   :  { %v76_v15 = vrot.slane %v64_v13, %v71_v12 }
  0xb1   :  { %v78_v16 = vsel %vm77_vm1, %v76_v15, %v72_v14 }
  0xb2   :  { %81 = vst.msk [vmem:[#allocation7] sm:$0x3] %vm80_vm2, %v78_v16 }
  0xb3   :  { %158 = shalt.err (!%p155_p0)
}
  0xb4   :  { %91 = dma.vmem_to_hbm [thread:$0]  %s89_s1, 32, %s206_s2, [#allocation4]  }
  0xb5   :  { %171 = dma.done.wait [#allocation4], 32  }
  0xb6   :  { %172 = vsyncadd [#allocation4], 4294967264 }
  0xb7   :  { %95 = vsyncpa [#allocation3], 1 }
  0xb8   :  { %96 = vsyncpa [#allocation6], 1 }
  0xb9   :  { %97 = vsyncpa [#allocation4], 1 }

</bundles_post_ra>
